<compile_context>
chip_gen: v7x
topology: tpu7x:2x2x1
jax: 0.10.0
libtpu: 0.0.40
codegen_flags: <defaults>
</compile_context>

<pallas_src>
import jax
import jax.numpy as jnp
from jax.experimental import pallas as pl
from jax.experimental.pallas import tpu as pltpu


# ------------------------------ fused kernel -------------------------------- #

def _gelu_erf(x):
    # Exact-erf GELU (PyTorch nn.GELU default).  erf via Abramowitz-Stegun 7.1.26
    # (max abs err ~1.5e-7 == f32-exact); only uses VPU/EUP ops (abs/exp/mul/add).
    z = x * 0.7071067811865476
    az = jnp.abs(z)
    t = 1.0 / (1.0 + 0.3275911 * az)
    poly = ((((1.061405429 * t - 1.453152027) * t + 1.421413741) * t
             - 0.284496736) * t + 0.254829592) * t
    erf_az = 1.0 - poly * jnp.exp(-az * az)
    erf_z = jnp.where(z >= 0, erf_az, -erf_az)
    return 0.5 * x * (1.0 + erf_z)


def _fused_forward_kernel(data_ref, adj_ref, w_ref, b_ref, o_ref, bd_ref):
    f32 = jnp.float32
    n = data_ref.shape[0]
    d = data_ref.shape[1] // 2          # utt_size == embedding_size in this config
    n_blk = bd_ref.shape[0] // n        # 2*num_bases + 1 (8 message blocks + root/identity)
    h1, h2 = d // 2, d // 4

    enc = data_ref[:, 0:d]              # raw encoding == utt_emb_before_gcn (decoder input)
    x_in = data_ref[:, d:2 * d]         # encoding + speaker embedding (gather done in glue)

    # ---- shrink: GELU((enc + spk_emb) @ W + b) -----------------------------------------
    x = jnp.dot(x_in, w_ref[0:d, 0:d], preferred_element_type=f32) + b_ref[0:1, 0:d]
    x = _gelu_erf(x)

    # ---- block-diag(x) into VMEM scratch (n_blk diagonal copies of x) ------------------
    bd_ref[...] = jnp.zeros_like(bd_ref)
    for blk in range(n_blk):            # static: n_blk small stores, offsets multiple of 8
        bd_ref[blk * n:(blk + 1) * n, blk * d:(blk + 1) * d] = x

    # ---- RGCN conv1 & conv3 as TWO wide-K matmuls (bases folded into adjacencies) ------
    #   t   = [A1_0 x | .. | A1_3 x | A3_0 x | .. | A3_3 x | x]        (n, n_blk*d)
    #   h12 = t @ [V1_0|0 ; .. ; 0|V3_3 ; root1|root3] + [b1|b3]       (n, 2d)
    t = jnp.dot(adj_ref[:, 0:n_blk * n], bd_ref[...], preferred_element_type=f32)
    off = d
    h12 = (jnp.dot(t, w_ref[off:off + n_blk * d, :], preferred_element_type=f32)
           + b_ref[1:2, :])

    # ---- GraphConv conv2 & conv4 (block-diagonal weights, aggr='add') ------------------
    off += n_blk * d
    ah = jnp.dot(adj_ref[:, n_blk * n:(n_blk + 1) * n], h12, preferred_element_type=f32)
    h_gc = (jnp.dot(ah, w_ref[off:off + 2 * d, :], preferred_element_type=f32)
            + jnp.dot(h12, w_ref[off + 2 * d:off + 4 * d, :], preferred_element_type=f32)
            + b_ref[2:3, :])

    # ---- decoder: Linear -> ReLU -> Linear -> ReLU -> Linear ---------------------------
    # cat([enc, conv2_out, conv4_out]) @ W1 split into enc-slab + gcn-slab dots.
    off += 4 * d
    h = (jnp.dot(enc, w_ref[off:off + d, 0:h1], preferred_element_type=f32)
         + jnp.dot(h_gc, w_ref[off + d:off + 3 * d, 0:h1], preferred_element_type=f32)
         + b_ref[3:4, 0:h1])
    h = jnp.maximum(h, 0.0)
    off += 3 * d
    h = jnp.maximum(jnp.dot(h, w_ref[off:off + h1, 0:h2], preferred_element_type=f32)
                    + b_ref[4:5, 0:h2], 0.0)
    off += h1
    # final layer computed with padded output width h2 (col 0 is the real logit; the
    # padding avoids a width-1 matmul and keeps the store wider than a single lane)
    o_ref[...] = (jnp.dot(h, w_ref[off:off + h2, 0:h2], preferred_element_type=f32)
                  + b_ref[5:6, 0:h2])


# ------------------------------- glue (JAX) --------------------------------- #

def _basis_adj_cat(edge_index, edge_type, comp, n_nodes):
    """(N, num_bases*N) slab: columns [b*N:(b+1)*N] hold A_b = sum_r comp[r,b] * A_r_norm.
    The per-edge weight comp[type]/deg is scattered directly into the basis tensors
    (no (num_relations, N, N) intermediate).  RGCNConv aggr='mean'."""
    src, dst = edge_index[0], edge_index[1]
    n_rel, n_bases = comp.shape
    deg = jnp.zeros((n_rel, n_nodes), jnp.float32).at[edge_type, dst].add(1.0)
    w = comp[edge_type] / jnp.maximum(deg[edge_type, dst], 1.0)[:, None]   # (E, n_bases)
    a = jnp.zeros((n_nodes, n_nodes, n_bases), jnp.float32).at[dst, src].add(w)
    return jnp.transpose(a, (0, 2, 1)).reshape(n_nodes, n_bases * n_nodes)


def _add_adj(edge_index, n_nodes):
    # GraphConv aggr='add', unit edge weights.
    src, dst = edge_index[0], edge_index[1]
    return jnp.zeros((n_nodes, n_nodes), jnp.float32).at[dst, src].add(1.0)


def _block_diag(a, b):
    d1, d2 = a.shape
    e1, e2 = b.shape
    out = jnp.zeros((d1 + e1, d2 + e2), jnp.float32)
    out = out.at[:d1, :d2].set(a)
    return out.at[d1:, d2:].set(b)


def pre_encoded_gcn_forward(params, encoding, speaker, edge_index, edge_type,
                            edge_speaker_type):
    f32 = jnp.float32
    n, utt = encoding.shape
    emb = params["shrink_w"].shape[0]                  # shrink_output_size
    assert utt == emb, "packed-slab layout assumes utt_size == shrink_output_size"
    n_bases = params["conv1_basis"].shape[0]
    n_blk = 2 * n_bases + 1                            # 8 message blocks + root/identity
    h1, h2 = emb // 2, emb // 4
    wcols = 2 * emb

    # ---- data slab: speaker-embedding gather done here (free in XLA) ----
    spk_e = params["spk_emb"][speaker]
    data_slab = jnp.concatenate([encoding, encoding + spk_e], axis=1).astype(f32)

    # ---- adjacency slab: [conv1 bases | conv3 bases | I | GraphConv adjacency] ----
    cat1 = _basis_adj_cat(edge_index, edge_type, params["conv1_comp"], n)
    cat3 = _basis_adj_cat(edge_index, edge_speaker_type, params["conv3_comp"], n)
    adj_slab = jnp.concatenate(
        [cat1, cat3, jnp.eye(n, dtype=f32), _add_adj(edge_index, n)], axis=1)

    # ---- weight slab: row-stacked, zero-padded to 2*emb lanes ----
    def pad_cols(m):
        m = m.astype(f32)
        return jnp.zeros((m.shape[0], wcols), f32).at[:, :m.shape[1]].set(m)

    v_ext = jnp.zeros((n_blk * emb, wcols), f32)
    for b in range(n_bases):
        v_ext = v_ext.at[b * emb:(b + 1) * emb, :emb].set(params["conv1_basis"][b])
        v_ext = v_ext.at[(n_bases + b) * emb:(n_bases + b + 1) * emb, emb:].set(
            params["conv3_basis"][b])
    v_ext = v_ext.at[2 * n_bases * emb:, :emb].set(params["conv1_root"])
    v_ext = v_ext.at[2 * n_bases * emb:, emb:].set(params["conv3_root"])

    dw1_t = params["dec_w1"].T                         # (utt + 2*emb, h1)
    w_slab = jnp.concatenate([
        pad_cols(params["shrink_w"].T),                                  # rows [0, emb)
        v_ext,                                                           # rows [emb, (n_blk+1)*emb)
        _block_diag(params["conv2_wrel"].T, params["conv4_wrel"].T),     # GraphConv rel
        _block_diag(params["conv2_wroot"].T, params["conv4_wroot"].T),   # GraphConv root
        pad_cols(dw1_t[:utt]),                                           # decoder: raw encoding slab
        pad_cols(dw1_t[utt:]),                                           # decoder: [conv2|conv4] slab
        pad_cols(params["dec_w2"].T),
        pad_cols(params["dec_w3"].T),
    ], axis=0)

    # ---- bias slab ----
    def pad_row(v):
        v = v.astype(f32)
        return jnp.zeros((1, wcols), f32).at[0, :v.shape[0]].set(v)

    b_slab = jnp.concatenate([
        pad_row(params["shrink_b"]),
        pad_row(jnp.concatenate([params["conv1_bias"], params["conv3_bias"]])),
        pad_row(jnp.concatenate([params["conv2_bias"], params["conv4_bias"]])),
        pad_row(params["dec_b1"]),
        pad_row(params["dec_b2"]),
        pad_row(params["dec_b3"]),
        jnp.zeros((2, wcols), f32),
    ], axis=0)                                          # (8, 2*emb)

    pred = pl.pallas_call(
        _fused_forward_kernel,
        out_shape=jax.ShapeDtypeStruct((n, h2), f32),   # col 0 is the logit
        in_specs=[pl.BlockSpec(memory_space=pltpu.MemorySpace.VMEM)] * 4,
        out_specs=pl.BlockSpec(memory_space=pltpu.MemorySpace.VMEM),
        scratch_shapes=[pltpu.VMEM((n_blk * n, n_blk * emb), f32)],      # block-diag(x)
        compiler_params=pltpu.CompilerParams(vmem_limit_bytes=32 * 1024 * 1024),
    )(data_slab, adj_slab, w_slab, b_slab)
    return pred[:, 0]                                   # .squeeze(1)


# --------------------------------- main -------------------------------------- #

if __name__ == "__main__":
    # sizes
    N_NODES = 16
    N_EDGES = 48
    UTT = 32            # utt_size == shrink_output_size == speaker_embedding_size
    EMB = 32            # embedding_size after shrink
    N_SPK = 4
    N_REL1 = 16                         # conv1 num_relations
    N_REL3 = N_SPK * N_SPK              # conv3 num_relations
    N_BASES = 4                         # rgcn_reg_basis
    H1, H2 = EMB // 2, EMB // 4         # decoder hidden sizes
    OUT = 1                             # DownStream.output_size
    MLP_IN = EMB * 3                    # speaker_relation=True

    root_key = jax.random.PRNGKey(0)
    ks = jax.random.split(root_key, 32)

    def nrm(k, shape, scale=0.1):
        return scale * jax.random.normal(k, shape, dtype=jnp.float32)

    params = {
        "spk_emb":     nrm(ks[0], (N_SPK, UTT)),
        "shrink_w":    nrm(ks[1], (EMB, UTT)),           # PyTorch [out, in]
        "shrink_b":    nrm(ks[2], (EMB,)),
        "conv1_basis": nrm(ks[3], (N_BASES, EMB, EMB)),  # [in, out] per basis
        "conv1_comp":  nrm(ks[4], (N_REL1, N_BASES)),
        "conv1_root":  nrm(ks[5], (EMB, EMB)),           # [in, out]
        "conv1_bias":  nrm(ks[6], (EMB,)),
        "conv2_wrel":  nrm(ks[7], (EMB, EMB)),           # PyTorch [out, in]
        "conv2_wroot": nrm(ks[8], (EMB, EMB)),
        "conv2_bias":  nrm(ks[9], (EMB,)),
        "conv3_basis": nrm(ks[10], (N_BASES, EMB, EMB)),
        "conv3_comp":  nrm(ks[11], (N_REL3, N_BASES)),
        "conv3_root":  nrm(ks[12], (EMB, EMB)),
        "conv3_bias":  nrm(ks[13], (EMB,)),
        "conv4_wrel":  nrm(ks[14], (EMB, EMB)),
        "conv4_wroot": nrm(ks[15], (EMB, EMB)),
        "conv4_bias":  nrm(ks[16], (EMB,)),
        "dec_w1":      nrm(ks[17], (H1, MLP_IN)),
        "dec_b1":      nrm(ks[18], (H1,)),
        "dec_w2":      nrm(ks[19], (H2, H1)),
        "dec_b2":      nrm(ks[20], (H2,)),
        "dec_w3":      nrm(ks[21], (OUT, H2)),
        "dec_b3":      nrm(ks[22], (OUT,)),
    }

    # sample inputs
    encoding = jax.random.normal(ks[23], (N_NODES, UTT), dtype=jnp.float32)
    speaker = jax.random.randint(ks[24], (N_NODES,), 0, N_SPK)
    edge_index = jax.random.randint(ks[25], (2, N_EDGES), 0, N_NODES)
    edge_type = jax.random.randint(ks[26], (N_EDGES,), 0, N_REL1)
    edge_speaker_type = speaker[edge_index[0]] * N_SPK + speaker[edge_index[1]]

    fwd = jax.jit(pre_encoded_gcn_forward)
    pred = fwd(params, encoding, speaker, edge_index, edge_type, edge_speaker_type)
    jax.block_until_ready(pred)
    assert pred.shape == (N_NODES,)
    print("KERNEL_OK")
</pallas_src>

<mosaic_0001>
module attributes {stable_mosaic.version = 11 : i64} {
  func.func private @main(%arg0: i32) attributes {dimension_semantics = [#tpu.dimension_semantics<core_parallel>], iteration_bounds = array<i64: 2>, tpu.core_type = #tpu.core_type<sc_scalar_subcore>, window_params = []} {
    return
  }
}

module attributes {stable_mosaic.version = 11 : i64} {
  func.func private @main(%arg0: i32) attributes {dimension_semantics = [#tpu.dimension_semantics<core_parallel>], iteration_bounds = array<i64: 2>, tpu.core_type = #tpu.core_type<sc_scalar_subcore>, window_params = []} {
    return
  }
}

module attributes {stable_mosaic.version = 11 : i64} {
  func.func @_fused_forward_kernel(%arg0: memref<16x64xf32, #tpu.memory_space<vmem>>, %arg1: memref<16x160xf32, #tpu.memory_space<vmem>>, %arg2: memref<568x64xf32, #tpu.memory_space<vmem>>, %arg3: memref<8x64xf32, #tpu.memory_space<vmem>>, %arg4: memref<16x8xf32, #tpu.memory_space<vmem>>, %arg5: memref<144x288xf32, #tpu.memory_space<vmem>>) attributes {dimension_semantics = [], scalar_prefetch = 0 : i64, scratch_operands = 1 : i64, tpu.core_type = #tpu.core_type<tc>} {
    %c0 = arith.constant 0 : index
    %c0_0 = arith.constant 0 : index
    %0 = vector.load %arg0[%c0, %c0_0] : memref<16x64xf32, #tpu.memory_space<vmem>>, vector<16x32xf32>
    %c0_1 = arith.constant 0 : index
    %c32 = arith.constant 32 : index
    %1 = vector.load %arg0[%c0_1, %c32] : memref<16x64xf32, #tpu.memory_space<vmem>>, vector<16x32xf32>
    %c0_2 = arith.constant 0 : index
    %c0_3 = arith.constant 0 : index
    %2 = vector.load %arg2[%c0_2, %c0_3] : memref<568x64xf32, #tpu.memory_space<vmem>>, vector<32x32xf32>
    %cst = arith.constant dense<0.000000e+00> : vector<16x32xf32>
    %3 = tpu.matmul %1, %2, %cst {dimension_numbers = #tpu.dot_dimension_numbers<[1], [0], [0], [1], [0, 0, 1, 1], [], []>} : vector<16x32xf32>, vector<32x32xf32>, vector<16x32xf32> -> vector<16x32xf32>
    %c0_4 = arith.constant 0 : index
    %c0_5 = arith.constant 0 : index
    %4 = vector.load %arg3[%c0_4, %c0_5] : memref<8x64xf32, #tpu.memory_space<vmem>>, vector<1x32xf32>
    %5 = vector.broadcast %4 : vector<1x32xf32> to vector<16x32xf32>
    %6 = arith.addf %3, %5 : vector<16x32xf32>
    %cst_6 = arith.constant 0.707106769 : f32
    %7 = vector.broadcast %cst_6 : f32 to vector<16x32xf32>
    %8 = arith.mulf %6, %7 : vector<16x32xf32>
    %9 = math.absf %8 : vector<16x32xf32>
    %cst_7 = arith.constant 0.327591091 : f32
    %10 = vector.broadcast %cst_7 : f32 to vector<16x32xf32>
    %11 = arith.mulf %10, %9 : vector<16x32xf32>
    %cst_8 = arith.constant 1.000000e+00 : f32
    %12 = vector.broadcast %cst_8 : f32 to vector<16x32xf32>
    %13 = arith.addf %12, %11 : vector<16x32xf32>
    %cst_9 = arith.constant 1.000000e+00 : f32
    %14 = vector.broadcast %cst_9 : f32 to vector<16x32xf32>
    %15 = arith.divf %14, %13 : vector<16x32xf32>
    %cst_10 = arith.constant 1.06140542 : f32
    %16 = vector.broadcast %cst_10 : f32 to vector<16x32xf32>
    %17 = arith.mulf %16, %15 : vector<16x32xf32>
    %cst_11 = arith.constant 1.45315206 : f32
    %18 = vector.broadcast %cst_11 : f32 to vector<16x32xf32>
    %19 = arith.subf %17, %18 : vector<16x32xf32>
    %20 = arith.mulf %19, %15 : vector<16x32xf32>
    %cst_12 = arith.constant 1.42141378 : f32
    %21 = vector.broadcast %cst_12 : f32 to vector<16x32xf32>
    %22 = arith.addf %20, %21 : vector<16x32xf32>
    %23 = arith.mulf %22, %15 : vector<16x32xf32>
    %cst_13 = arith.constant 0.284496725 : f32
    %24 = vector.broadcast %cst_13 : f32 to vector<16x32xf32>
    %25 = arith.subf %23, %24 : vector<16x32xf32>
    %26 = arith.mulf %25, %15 : vector<16x32xf32>
    %cst_14 = arith.constant 0.254829586 : f32
    %27 = vector.broadcast %cst_14 : f32 to vector<16x32xf32>
    %28 = arith.addf %26, %27 : vector<16x32xf32>
    %29 = arith.mulf %28, %15 : vector<16x32xf32>
    %cst_15 = arith.constant 0.000000e+00 : f32
    %30 = vector.broadcast %cst_15 : f32 to vector<16x32xf32>
    %31 = arith.subf %30, %9 : vector<16x32xf32>
    %32 = arith.mulf %31, %9 : vector<16x32xf32>
    %33 = math.exp %32 : vector<16x32xf32>
    %34 = arith.mulf %29, %33 : vector<16x32xf32>
    %cst_16 = arith.constant 1.000000e+00 : f32
    %35 = vector.broadcast %cst_16 : f32 to vector<16x32xf32>
    %36 = arith.subf %35, %34 : vector<16x32xf32>
    %cst_17 = arith.constant 0.000000e+00 : f32
    %37 = vector.broadcast %cst_17 : f32 to vector<16x32xf32>
    %38 = arith.cmpf oge, %8, %37 : vector<16x32xf32>
    %cst_18 = arith.constant 0.000000e+00 : f32
    %39 = vector.broadcast %cst_18 : f32 to vector<16x32xf32>
    %40 = arith.subf %39, %36 : vector<16x32xf32>
    %41 = arith.select %38, %36, %40 : vector<16x32xi1>, vector<16x32xf32>
    %cst_19 = arith.constant 5.000000e-01 : f32
    %42 = vector.broadcast %cst_19 : f32 to vector<16x32xf32>
    %43 = arith.mulf %42, %6 : vector<16x32xf32>
    %cst_20 = arith.constant 1.000000e+00 : f32
    %44 = vector.broadcast %cst_20 : f32 to vector<16x32xf32>
    %45 = arith.addf %44, %41 : vector<16x32xf32>
    %46 = arith.mulf %43, %45 : vector<16x32xf32>
    %cst_21 = arith.constant 0.000000e+00 : f32
    %47 = vector.broadcast %cst_21 : f32 to vector<144x288xf32>
    %c0_22 = arith.constant 0 : index
    %c0_23 = arith.constant 0 : index
    %48 = vector.load %arg5[%c0_22, %c0_23] : memref<144x288xf32, #tpu.memory_space<vmem>>, vector<144x288xf32>
    tpu.vector_store %arg5[%c0_22, %c0_23], %47 {strides = array<i32>} : memref<144x288xf32, #tpu.memory_space<vmem>>, vector<144x288xf32>,
    %c0_24 = arith.constant 0 : index
    %c0_25 = arith.constant 0 : index
    %49 = vector.load %arg5[%c0_24, %c0_25] : memref<144x288xf32, #tpu.memory_space<vmem>>, vector<16x32xf32>
    tpu.vector_store %arg5[%c0_24, %c0_25], %46 {strides = array<i32>} : memref<144x288xf32, #tpu.memory_space<vmem>>, vector<16x32xf32>,
    %c16 = arith.constant 16 : index
    %c32_26 = arith.constant 32 : index
    %50 = vector.load %arg5[%c16, %c32_26] : memref<144x288xf32, #tpu.memory_space<vmem>>, vector<16x32xf32>
    tpu.vector_store %arg5[%c16, %c32_26], %46 {strides = array<i32>} : memref<144x288xf32, #tpu.memory_space<vmem>>, vector<16x32xf32>,
    %c32_27 = arith.constant 32 : index
    %c64 = arith.constant 64 : index
    %51 = vector.load %arg5[%c32_27, %c64] : memref<144x288xf32, #tpu.memory_space<vmem>>, vector<16x32xf32>
    tpu.vector_store %arg5[%c32_27, %c64], %46 {strides = array<i32>} : memref<144x288xf32, #tpu.memory_space<vmem>>, vector<16x32xf32>,
    %c48 = arith.constant 48 : index
    %c96 = arith.constant 96 : index
    %52 = vector.load %arg5[%c48, %c96] : memref<144x288xf32, #tpu.memory_space<vmem>>, vector<16x32xf32>
    tpu.vector_store %arg5[%c48, %c96], %46 {strides = array<i32>} : memref<144x288xf32, #tpu.memory_space<vmem>>, vector<16x32xf32>,
    %c64_28 = arith.constant 64 : index
    %c128 = arith.constant 128 : index
    %53 = vector.load %arg5[%c64_28, %c128] : memref<144x288xf32, #tpu.memory_space<vmem>>, vector<16x32xf32>
    tpu.vector_store %arg5[%c64_28, %c128], %46 {strides = array<i32>} : memref<144x288xf32, #tpu.memory_space<vmem>>, vector<16x32xf32>,
    %c80 = arith.constant 80 : index
    %c160 = arith.constant 160 : index
    %54 = vector.load %arg5[%c80, %c160] : memref<144x288xf32, #tpu.memory_space<vmem>>, vector<16x32xf32>
    tpu.vector_store %arg5[%c80, %c160], %46 {strides = array<i32>} : memref<144x288xf32, #tpu.memory_space<vmem>>, vector<16x32xf32>,
    %c96_29 = arith.constant 96 : index
    %c192 = arith.constant 192 : index
    %55 = vector.load %arg5[%c96_29, %c192] : memref<144x288xf32, #tpu.memory_space<vmem>>, vector<16x32xf32>
    tpu.vector_store %arg5[%c96_29, %c192], %46 {strides = array<i32>} : memref<144x288xf32, #tpu.memory_space<vmem>>, vector<16x32xf32>,
    %c112 = arith.constant 112 : index
    %c224 = arith.constant 224 : index
    %56 = vector.load %arg5[%c112, %c224] : memref<144x288xf32, #tpu.memory_space<vmem>>, vector<16x32xf32>
    tpu.vector_store %arg5[%c112, %c224], %46 {strides = array<i32>} : memref<144x288xf32, #tpu.memory_space<vmem>>, vector<16x32xf32>,
    %c128_30 = arith.constant 128 : index
    %c256 = arith.constant 256 : index
    %57 = vector.load %arg5[%c128_30, %c256] : memref<144x288xf32, #tpu.memory_space<vmem>>, vector<16x32xf32>
    tpu.vector_store %arg5[%c128_30, %c256], %46 {strides = array<i32>} : memref<144x288xf32, #tpu.memory_space<vmem>>, vector<16x32xf32>,
    %c0_31 = arith.constant 0 : index
    %c0_32 = arith.constant 0 : index
    %58 = vector.load %arg1[%c0_31, %c0_32] : memref<16x160xf32, #tpu.memory_space<vmem>>, vector<16x144xf32>
    %c0_33 = arith.constant 0 : index
    %c0_34 = arith.constant 0 : index
    %59 = vector.load %arg5[%c0_33, %c0_34] : memref<144x288xf32, #tpu.memory_space<vmem>>, vector<144x288xf32>
    %cst_35 = arith.constant dense<0.000000e+00> : vector<16x288xf32>
    %60 = tpu.matmul %58, %59, %cst_35 {dimension_numbers = #tpu.dot_dimension_numbers<[1], [0], [0], [1], [0, 0, 1, 1], [], []>} : vector<16x144xf32>, vector<144x288xf32>, vector<16x288xf32> -> vector<16x288xf32>
    %c32_36 = arith.constant 32 : index
    %c0_37 = arith.constant 0 : index
    %61 = vector.load %arg2[%c32_36, %c0_37] : memref<568x64xf32, #tpu.memory_space<vmem>>, vector<288x64xf32>
    %cst_38 = arith.constant dense<0.000000e+00> : vector<16x64xf32>
    %62 = tpu.matmul %60, %61, %cst_38 {dimension_numbers = #tpu.dot_dimension_numbers<[1], [0], [0], [1], [0, 0, 1, 1], [], []>} : vector<16x288xf32>, vector<288x64xf32>, vector<16x64xf32> -> vector<16x64xf32>
    %c1 = arith.constant 1 : index
    %c0_39 = arith.constant 0 : index
    %63 = vector.load %arg3[%c1, %c0_39] : memref<8x64xf32, #tpu.memory_space<vmem>>, vector<1x64xf32>
    %64 = vector.broadcast %63 : vector<1x64xf32> to vector<16x64xf32>
    %65 = arith.addf %62, %64 : vector<16x64xf32>
    %c0_40 = arith.constant 0 : index
    %c144 = arith.constant 144 : index
    %66 = vector.load %arg1[%c0_40, %c144] : memref<16x160xf32, #tpu.memory_space<vmem>>, vector<16x16xf32>
    %cst_41 = arith.constant dense<0.000000e+00> : vector<16x64xf32>
    %67 = tpu.matmul %66, %65, %cst_41 {dimension_numbers = #tpu.dot_dimension_numbers<[1], [0], [0], [1], [0, 0, 1, 1], [], []>} : vector<16x16xf32>, vector<16x64xf32>, vector<16x64xf32> -> vector<16x64xf32>
    %c320 = arith.constant 320 : index
    %c0_42 = arith.constant 0 : index
    %68 = vector.load %arg2[%c320, %c0_42] : memref<568x64xf32, #tpu.memory_space<vmem>>, vector<64x64xf32>
    %cst_43 = arith.constant dense<0.000000e+00> : vector<16x64xf32>
    %69 = tpu.matmul %67, %68, %cst_43 {dimension_numbers = #tpu.dot_dimension_numbers<[1], [0], [0], [1], [0, 0, 1, 1], [], []>} : vector<16x64xf32>, vector<64x64xf32>, vector<16x64xf32> -> vector<16x64xf32>
    %c384 = arith.constant 384 : index
    %c0_44 = arith.constant 0 : index
    %70 = vector.load %arg2[%c384, %c0_44] : memref<568x64xf32, #tpu.memory_space<vmem>>, vector<64x64xf32>
    %cst_45 = arith.constant dense<0.000000e+00> : vector<16x64xf32>
    %71 = tpu.matmul %65, %70, %cst_45 {dimension_numbers = #tpu.dot_dimension_numbers<[1], [0], [0], [1], [0, 0, 1, 1], [], []>} : vector<16x64xf32>, vector<64x64xf32>, vector<16x64xf32> -> vector<16x64xf32>
    %72 = arith.addf %69, %71 : vector<16x64xf32>
    %c2 = arith.constant 2 : index
    %c0_46 = arith.constant 0 : index
    %73 = vector.load %arg3[%c2, %c0_46] : memref<8x64xf32, #tpu.memory_space<vmem>>, vector<1x64xf32>
    %74 = vector.broadcast %73 : vector<1x64xf32> to vector<16x64xf32>
    %75 = arith.addf %72, %74 : vector<16x64xf32>
    %c448 = arith.constant 448 : index
    %c0_47 = arith.constant 0 : index
    %76 = vector.load %arg2[%c448, %c0_47] : memref<568x64xf32, #tpu.memory_space<vmem>>, vector<32x16xf32>
    %cst_48 = arith.constant dense<0.000000e+00> : vector<16x16xf32>
    %77 = tpu.matmul %0, %76, %cst_48 {dimension_numbers = #tpu.dot_dimension_numbers<[1], [0], [0], [1], [0, 0, 1, 1], [], []>} : vector<16x32xf32>, vector<32x16xf32>, vector<16x16xf32> -> vector<16x16xf32>
    %c480 = arith.constant 480 : index
    %c0_49 = arith.constant 0 : index
    %78 = vector.load %arg2[%c480, %c0_49] : memref<568x64xf32, #tpu.memory_space<vmem>>, vector<64x16xf32>
    %cst_50 = arith.constant dense<0.000000e+00> : vector<16x16xf32>
    %79 = tpu.matmul %75, %78, %cst_50 {dimension_numbers = #tpu.dot_dimension_numbers<[1], [0], [0], [1], [0, 0, 1, 1], [], []>} : vector<16x64xf32>, vector<64x16xf32>, vector<16x16xf32> -> vector<16x16xf32>
    %80 = arith.addf %77, %79 : vector<16x16xf32>
    %c3 = arith.constant 3 : index
    %c0_51 = arith.constant 0 : index
    %81 = vector.load %arg3[%c3, %c0_51] : memref<8x64xf32, #tpu.memory_space<vmem>>, vector<1x16xf32>
    %82 = vector.broadcast %81 : vector<1x16xf32> to vector<16x16xf32>
    %83 = arith.addf %80, %82 : vector<16x16xf32>
    %cst_52 = arith.constant 0.000000e+00 : f32
    %84 = vector.broadcast %cst_52 : f32 to vector<16x16xf32>
    %85 = arith.maximumf %83, %84 : vector<16x16xf32>
    %c544 = arith.constant 544 : index
    %c0_53 = arith.constant 0 : index
    %86 = vector.load %arg2[%c544, %c0_53] : memref<568x64xf32, #tpu.memory_space<vmem>>, vector<16x8xf32>
    %cst_54 = arith.constant dense<0.000000e+00> : vector<16x8xf32>
    %87 = tpu.matmul %85, %86, %cst_54 {dimension_numbers = #tpu.dot_dimension_numbers<[1], [0], [0], [1], [0, 0, 1, 1], [], []>} : vector<16x16xf32>, vector<16x8xf32>, vector<16x8xf32> -> vector<16x8xf32>
    %c4 = arith.constant 4 : index
    %c0_55 = arith.constant 0 : index
    %88 = vector.load %arg3[%c4, %c0_55] : memref<8x64xf32, #tpu.memory_space<vmem>>, vector<1x8xf32>
    %89 = vector.broadcast %88 : vector<1x8xf32> to vector<16x8xf32>
    %90 = arith.addf %87, %89 : vector<16x8xf32>
    %cst_56 = arith.constant 0.000000e+00 : f32
    %91 = vector.broadcast %cst_56 : f32 to vector<16x8xf32>
    %92 = arith.maximumf %90, %91 : vector<16x8xf32>
    %c560 = arith.constant 560 : index
    %c0_57 = arith.constant 0 : index
    %93 = vector.load %arg2[%c560, %c0_57] : memref<568x64xf32, #tpu.memory_space<vmem>>, vector<8x8xf32>
    %cst_58 = arith.constant dense<0.000000e+00> : vector<16x8xf32>
    %94 = tpu.matmul %92, %93, %cst_58 {dimension_numbers = #tpu.dot_dimension_numbers<[1], [0], [0], [1], [0, 0, 1, 1], [], []>} : vector<16x8xf32>, vector<8x8xf32>, vector<16x8xf32> -> vector<16x8xf32>
    %c5 = arith.constant 5 : index
    %c0_59 = arith.constant 0 : index
    %95 = vector.load %arg3[%c5, %c0_59] : memref<8x64xf32, #tpu.memory_space<vmem>>, vector<1x8xf32>
    %96 = vector.broadcast %95 : vector<1x8xf32> to vector<16x8xf32>
    %97 = arith.addf %94, %96 : vector<16x8xf32>
    %c0_60 = arith.constant 0 : index
    %c0_61 = arith.constant 0 : index
    %98 = vector.load %arg4[%c0_60, %c0_61] : memref<16x8xf32, #tpu.memory_space<vmem>>, vector<16x8xf32>
    tpu.vector_store %arg4[%c0_60, %c0_61], %97 {strides = array<i32>} : memref<16x8xf32, #tpu.memory_space<vmem>>, vector<16x8xf32>,
    return
  }
}

</mosaic_0001>

<bundles_post_ra>
// kernel: pre_encoded_gcn_forward.1
= control target key start
LH: loop header
LB: loop body
LE: loop exit
PB: predicated region body
PF: predicated region fallthrough
CT: control target
= control target key end

     0   :  { %s1742_s19 = smov 96   ;;  %vm34_vm0 = vcmask 261120   ;;  %v1743_v10 = vmov 0.0   ;;  %v1744_v14 = vmov 0.0|0.0   ;;  %s1745_s29 = smov 32   ;;  %vm321_vm3 = vcmask 130048   ;;  %s2125_s0 = inlined_call_operand.vmem [shape: f32[16,64], index: 0, kind: input, shape index: {}]   ;;  %s2126_s2 = inlined_call_operand.vmem [shape: f32[568,64], index: 2, kind: input, shape index: {}]   ;;  %s2127_s3 = inlined_call_operand.vmem [shape: f32[8,64], index: 3, kind: input, shape index: {}]   ;;  %s2128_s1 = inlined_call_operand.vmem [shape: f32[16,160], index: 1, kind: input, shape index: {}]   ;;  %s2129_s4 = inlined_call_operand.vmem [shape: f32[16,8], index: 4, kind: output, shape index: {}]  }
   0x1   :  { %v1776_v0 = vld [vmem:[%s2125_s0] sm:$0xff]  ;;  %v20_v2 = vld [vmem:[%s2126_s2 + $0x8] sm:$0xff]  ;;  %v21_v3 = vld [vmem:[%s2126_s2 + $0x10] sm:$0xff]  ;;  %171 = vst [vmem:[#allocation2 + $0x18] sm:$0xff] %v1743_v10  ;;  %1558 = vmatprep.subr.bf16.mxu1 %v1744_v14  ;;  %s1746_s30 = smov 64   ;;  %vm232_vm4 = vcmask 523520  }
   0x2   :  { %v19_v1 = vld [vmem:[%s2126_s2] sm:$0xff]  ;;  %30 = vrot.lane.b32.xlu0 %v1776_v0, %s1742_s19  ;;  %v22_v4 = vld [vmem:[%s2126_s2 + $0x18] sm:$0xff]  ;;  %v1795_v5 = vld [vmem:[%s2125_s0 + $0x8] sm:$0xff]  ;;  %196 = vst [vmem:[#allocation2 + $0xe0] sm:$0xff] %v1743_v10  ;;  %vm241_vm5 = vcmask 785920   ;;  %vm250_vm6 = vcmask 1048320  }
   0x3   :  { %v1549_v6 = vpack.c.bf16 %v20_v2, %v19_v1  ;;  %v1553_v7 = vpack.c.bf16 %v22_v4, %v21_v3  ;;  %221 = vst.msk [vmem:[#allocation2 + $0x1a8] sm:$0xff] %vm34_vm0, %v1743_v10  ;;  %168 = vst [vmem:[#allocation2] sm:$0xff] %v1743_v10  ;;  %v1311_v36 = vld [vmem:[%s2127_s3] ss:$0 sm:$0xff]  ;;  %s1747_s0 = smov 112   ;;  %vm776_vm7 = vcmask 523264  }
   0x4   :  { %170 = vst.msk [vmem:[#allocation2 + $0x10] sm:$0xff] %vm34_vm0, %v1743_v10  ;;  %173 = vst.msk [vmem:[#allocation2 + $0x28] sm:$0xff] %vm34_vm0, %v1743_v10  ;;  %vm1223_vm8 = vcmask 64512  }
   0x5   :  { %1550 = vmatprep.subr.bf16.mxu0 %v1549_v6  ;;  %174 = vst [vmem:[#allocation2 + $0x30] sm:$0xff] %v1743_v10  ;;  %176 = vst.msk [vmem:[#allocation2 + $0x40] sm:$0xff] %vm34_vm0, %v1743_v10 }
   0x6   :  { %32 = vrot.lane.b32.xlu0 %v1795_v5, %s1742_s19  ;;  %1552 = vmatpush3.bf16.msra.mxu0 %v1549_v6  ;;  %177 = vst [vmem:[#allocation2 + $0x48] sm:$0xff] %v1743_v10  ;;  %179 = vst.msk [vmem:[#allocation2 + $0x58] sm:$0xff] %vm34_vm0, %v1743_v10 }
   0x7   :  { %1554 = vmatprep.subr.bf16.mxu0 %v1553_v7  ;;  %180 = vst [vmem:[#allocation2 + $0x60] sm:$0xff] %v1743_v10  ;;  %182 = vst.msk [vmem:[#allocation2 + $0x70] sm:$0xff] %vm34_vm0, %v1743_v10 }
   0x8   :  { %183 = vst [vmem:[#allocation2 + $0x78] sm:$0xff] %v1743_v10  ;;  %185 = vst.msk [vmem:[#allocation2 + $0x88] sm:$0xff] %vm34_vm0, %v1743_v10 }
   0x9   :  { %186 = vst [vmem:[#allocation2 + $0x90] sm:$0xff] %v1743_v10  ;;  %188 = vst.msk [vmem:[#allocation2 + $0xa0] sm:$0xff] %vm34_vm0, %v1743_v10 }
   0xa   :  { %1556 = vmatpush3.bf16.msra.mxu0 %v1553_v7  ;;  %189 = vst [vmem:[#allocation2 + $0xa8] sm:$0xff] %v1743_v10  ;;  %191 = vst.msk [vmem:[#allocation2 + $0xb8] sm:$0xff] %vm34_vm0, %v1743_v10 }
   0xb   :  { %193 = vst [vmem:[#allocation2 + $0xc8] sm:$0xff] %v1743_v10  ;;  %194 = vst.msk [vmem:[#allocation2 + $0xd0] sm:$0xff] %vm34_vm0, %v1743_v10  ;;  %v269_v11 = vld [vmem:[#allocation2 + $0x10] sm:$0xff]  ;;  %v272_v12 = vld [vmem:[#allocation2 + $0x28] sm:$0xff]  ;;  %1593 = vmatprep.subr.bf16.mxu0 %v1744_v14 }
   0xc   :  { %197 = vst.msk [vmem:[#allocation2 + $0xe8] sm:$0xff] %vm34_vm0, %v1743_v10  ;;  %199 = vst [vmem:[#allocation2 + $0xf8] sm:$0xff] %v1743_v10  ;;  %v1594_v13 = vpack.c.bf16 %v272_v12, %v269_v11  ;;  %v275_v15 = vld [vmem:[#allocation2 + $0x40] sm:$0xff] }
   0xd   :  { %200 = vst.msk [vmem:[#allocation2 + $0x100] sm:$0xff] %vm34_vm0, %v1743_v10  ;;  %202 = vst [vmem:[#allocation2 + $0x110] sm:$0xff] %v1743_v10  ;;  %v278_v16 = vld [vmem:[#allocation2 + $0x58] sm:$0xff] }
   0xe   :  { %203 = vst.msk [vmem:[#allocation2 + $0x118] sm:$0xff] %vm34_vm0, %v1743_v10  ;;  %205 = vst [vmem:[#allocation2 + $0x128] sm:$0xff] %v1743_v10  ;;  %v1597_v17 = vpack.c.bf16 %v278_v16, %v275_v15  ;;  %v281_v18 = vld [vmem:[#allocation2 + $0x70] sm:$0xff] }
   0xf   :  { %206 = vst.msk [vmem:[#allocation2 + $0x130] sm:$0xff] %vm34_vm0, %v1743_v10  ;;  %208 = vst [vmem:[#allocation2 + $0x140] sm:$0xff] %v1743_v10  ;;  %v284_v19 = vld [vmem:[#allocation2 + $0x88] sm:$0xff] }
  0x10   :  { %209 = vst.msk [vmem:[#allocation2 + $0x148] sm:$0xff] %vm34_vm0, %v1743_v10  ;;  %211 = vst [vmem:[#allocation2 + $0x158] sm:$0xff] %v1743_v10  ;;  %v1600_v20 = vpack.c.bf16 %v284_v19, %v281_v18  ;;  %v287_v21 = vld [vmem:[#allocation2 + $0xa0] sm:$0xff] }
  0x11   :  { %212 = vst.msk [vmem:[#allocation2 + $0x160] sm:$0xff] %vm34_vm0, %v1743_v10  ;;  %214 = vst [vmem:[#allocation2 + $0x170] sm:$0xff] %v1743_v10  ;;  %v290_v22 = vld [vmem:[#allocation2 + $0xb8] sm:$0xff] }
  0x12   :  { %215 = vst.msk [vmem:[#allocation2 + $0x178] sm:$0xff] %vm34_vm0, %v1743_v10  ;;  %218 = vst.msk [vmem:[#allocation2 + $0x190] sm:$0xff] %vm34_vm0, %v1743_v10  ;;  %v1603_v23 = vpack.c.bf16 %v290_v22, %v287_v21  ;;  %v293_v24 = vld [vmem:[#allocation2 + $0xd0] sm:$0xff] }
  0x13   :  { %v296_v25 = vld [vmem:[#allocation2 + $0xe8] sm:$0xff] }
  0x14   :  { %v1606_v26 = vpack.c.bf16 %v296_v25, %v293_v24  ;;  %v299_v27 = vld [vmem:[#allocation2 + $0x100] sm:$0xff] }
  0x15   :  { %v302_v28 = vld [vmem:[#allocation2 + $0x118] sm:$0xff] }
  0x16   :  { %v1609_v29 = vpack.c.bf16 %v302_v28, %v299_v27  ;;  %v305_v30 = vld [vmem:[#allocation2 + $0x130] sm:$0xff] }
  0x17   :  { %v308_v31 = vld [vmem:[#allocation2 + $0x148] sm:$0xff] }
  0x18   :  { %v1612_v32 = vpack.c.bf16 %v308_v31, %v305_v30  ;;  %v311_v33 = vld [vmem:[#allocation2 + $0x160] sm:$0xff] }
  0x19   :  { %v314_v34 = vld [vmem:[#allocation2 + $0x178] sm:$0xff] }
  0x1a   :  { %v1615_v35 = vpack.c.bf16 %v314_v34, %v311_v33 }
  0x74   :  { %v31_v8 = vpop.permute.xlu0 %30 }
  0x75   :  { %1448 = vmatprep.mubr.msk.f32.mxu0 %vm34_vm0, %v31_v8 }
  0x78   :  { %v33_v9 = vpop.permute.xlu0 %32 }
  0x79   :  { %1449 = vmatmul.mubr.msk.f32.vlgmr.msra.gmra.mrb[0].mxu0 %vm34_vm0, %v33_v9 }
  0x7a   :  { %1595 = vmatpush1.bf16.msra.mxu0 %v1594_v13 }
  0x7b   :  { %1596 = vmatprep.subr.bf16.mxu0 %v1744_v14 }
  0x7e   :  { %1598 = vmatpush1.bf16.msra.mxu0 %v1597_v17 }
  0x7f   :  { %1599 = vmatprep.subr.bf16.mxu0 %v1744_v14 }
  0x82   :  { %1601 = vmatpush1.bf16.msra.mxu0 %v1600_v20 }
  0x83   :  { %1602 = vmatprep.subr.bf16.mxu0 %v1744_v14 }
  0x86   :  { %1604 = vmatpush1.bf16.msra.mxu0 %v1603_v23 }
  0x87   :  { %1605 = vmatprep.subr.bf16.mxu0 %v1744_v14 }
  0x8a   :  { %1607 = vmatpush1.bf16.msra.mxu0 %v1606_v26 }
  0x8b   :  { %1608 = vmatprep.subr.bf16.mxu0 %v1744_v14 }
  0x8e   :  { %1610 = vmatpush1.bf16.msra.mxu0 %v1609_v29 }
  0x8f   :  { %1611 = vmatprep.subr.bf16.mxu0 %v1744_v14 }
  0x92   :  { %1613 = vmatpush1.bf16.msra.mxu0 %v1612_v32 }
  0x93   :  { %1614 = vmatprep.subr.bf16.mxu0 %v1744_v14 }
  0x96   :  { %1616 = vmatpush1.bf16.msra.mxu0 %v1615_v35 }
  0x97   :  { %1617 = vmatprep.subr.bf16.mxu0 %v1744_v14 }
 0x14c   :  { %v1450_v37 = vpop.f32.mrb[0].mxu0 }
 0x14d   :  { %v111_v38 = vadd.f32 %v1450_v37, %v1311_v36  ;;  %v105_v39 = vpop.f32.mrb[1].mxu0  ;;  %v1851_v37 = vld [vmem:[%s2128_s1] sm:$0xff] }
 0x14e   :  { %v106_v40 = vadd.f32 %v1311_v36, %v105_v39  ;;  %v1844_v36 = vld [vmem:[%s2128_s1 + $0x8] sm:$0xff]  ;;  %v1866_v39 = vld [vmem:[%s2128_s1 + $0x10] sm:$0xff] }
 0x14f   :  { %v115_v41 = vmul.f32 0.70710677, %v111_v38  ;;  %v163_v23 = vmul.f32 0.5, %v111_v38  ;;  %1318 = vmatprep.mubr.msk.f32.mxu1 %vm321_vm3, %v1844_v36  ;;  %1320 = vmatprep.mubr.msk.f32.mxu0 %vm321_vm3, %v1844_v36  ;;  %v1859_v38 = vld [vmem:[%s2128_s1 + $0x18] sm:$0xff] }
 0x150   :  { %v114_v42 = vmul.f32 0.70710677, %v106_v40  ;;  %v162_v26 = vmul.f32 0.5, %v106_v40  ;;  %v512_v40 = vld [vmem:[%s2126_s2 + $0x120] sm:$0xff] }
 0x151   :  { %v117_v43 = vand.u32 2147483647, %v115_v41  ;;  %vm157_vm1 = vcmp.ge.f32.partialorder %v115_v41, 0.0  ;;  %v513_v41 = vld [vmem:[%s2126_s2 + $0x128] sm:$0xff] }
 0x152   :  { %v116_v44 = vand.u32 2147483647, %v114_v42  ;;  %vm156_vm2 = vcmp.ge.f32.partialorder %v114_v42, 0.0  ;;  %v1652_v42 = vpack.c.bf16 %v513_v41, %v512_v40  ;;  %v507_v40 = vld [vmem:[%s2126_s2 + $0xf8] sm:$0xff] }
 0x153   :  { %v119_v45 = vmul.f32 0.3275911, %v117_v43  ;;  %v145_v49 = vsub.f32 0.0, %v117_v43 }
 0x154   :  { %v118_v46 = vmul.f32 0.3275911, %v116_v44  ;;  %v144_v50 = vsub.f32 0.0, %v116_v44 }
 0x155   :  { %v121_v47 = vadd.f32 1.0, %v119_v45  ;;  %v147_v52 = vmul.f32 %v145_v49, %v117_v43 }
 0x156   :  { %v120_v48 = vadd.f32 1.0, %v118_v46  ;;  %v146_v55 = vmul.f32 %v144_v50, %v116_v44 }
 0x157   :  { %1734 = vrcp.f32 %v121_v47  ;;  %v150_v58 = vmul.f32 1.442695, %v147_v52 }
 0x158   :  { %1736 = vrcp.f32 %v120_v48  ;;  %v148_v61 = vmul.f32 1.442695, %v146_v55 }
 0x159   :  { %1738 = vpow2.f32 %v150_v58 }
 0x15a   :  { %1740 = vpow2.f32 %v148_v61 }
 0x161   :  { %v1735_v51 = vpop.eup %1734 }
 0x162   :  { %v1737_v53 = vpop.eup %1736  ;;  %v127_v54 = vmul.f32 1.0614054, %v1735_v51 }
 0x163   :  { %v126_v56 = vmul.f32 1.0614054, %v1737_v53  ;;  %v1739_v12 = vpop.eup %1738 }
 0x164   :  { %v1315_v57 = vadd.f32 -1.4531521, %v127_v54  ;;  %v1741_v15 = vpop.eup %1740 }
 0x165   :  { %v1314_v59 = vadd.f32 -1.4531521, %v126_v56 }
 0x166   :  { %v131_v60 = vmul.f32 %v1735_v51, %v1315_v57 }
 0x167   :  { %v130_v62 = vmul.f32 %v1737_v53, %v1314_v59 }
 0x168   :  { %v133_v63 = vadd.f32 1.4214138, %v131_v60 }
 0x169   :  { %v132_v1 = vadd.f32 1.4214138, %v130_v62 }
 0x16a   :  { %v135_v2 = vmul.f32 %v1735_v51, %v133_v63 }
 0x16b   :  { %v134_v3 = vmul.f32 %v1737_v53, %v132_v1 }
 0x16c   :  { %v1317_v4 = vadd.f32 -0.28449672, %v135_v2 }
 0x16d   :  { %v1316_v6 = vadd.f32 -0.28449672, %v134_v3 }
 0x16e   :  { %v139_v7 = vmul.f32 %v1735_v51, %v1317_v4 }
 0x16f   :  { %v138_v8 = vmul.f32 %v1737_v53, %v1316_v6 }
 0x170   :  { %v141_v9 = vadd.f32 0.2548296, %v139_v7 }
 0x171   :  { %v140_v10 = vadd.f32 0.2548296, %v138_v8  ;;  %v496_v8 = vld [vmem:[%s2126_s2 + $0xa0] sm:$0xff] }
 0x172   :  { %v143_v11 = vmul.f32 %v1735_v51, %v141_v9  ;;  %v497_v9 = vld [vmem:[%s2126_s2 + $0xa8] sm:$0xff] }
 0x173   :  { %v142_v13 = vmul.f32 %v1737_v53, %v140_v10  ;;  %v1620_v10 = vpack.c.bf16 %v497_v9, %v496_v8 }
 0x174   :  { %v153_v16 = vmul.f32 %v1739_v12, %v143_v11  ;;  %v480_v11 = vld [vmem:[%s2126_s2 + $0x20] sm:$0xff]  ;;  %v481_v12 = vld [vmem:[%s2126_s2 + $0x28] sm:$0xff] }
 0x175   :  { %v152_v17 = vmul.f32 %v1741_v15, %v142_v13  ;;  %v498_v13 = vld [vmem:[%s2126_s2 + $0xb0] sm:$0xff]  ;;  %v499_v15 = vld [vmem:[%s2126_s2 + $0xb8] sm:$0xff] }
 0x176   :  { %v155_v18 = vsub.f32 1.0, %v153_v16  ;;  %v1622_v16 = vpack.c.bf16 %v481_v12, %v480_v11 }
 0x177   :  { %v154_v19 = vsub.f32 1.0, %v152_v17  ;;  %v1624_v17 = vpack.c.bf16 %v499_v15, %v498_v13 }
 0x178   :  { %v159_v20 = vsub.f32 0.0, %v155_v18 }
 0x179   :  { %v158_v21 = vsub.f32 0.0, %v154_v19 }
 0x17a   :  { %v161_v22 = vsel %vm157_vm1, %v155_v18, %v159_v20  ;;  %v482_v18 = vld [vmem:[%s2126_s2 + $0x30] sm:$0xff]  ;;  %v500_v20 = vld [vmem:[%s2126_s2 + $0xc0] sm:$0xff] }
 0x17b   :  { %v165_v24 = vadd.f32 1.0, %v161_v22  ;;  %v160_v25 = vsel %vm156_vm2, %v154_v19, %v158_v21  ;;  %v483_v19 = vld [vmem:[%s2126_s2 + $0x38] sm:$0xff]  ;;  %v501_v21 = vld [vmem:[%s2126_s2 + $0xc8] sm:$0xff] }
 0x17c   :  { %v164_v27 = vadd.f32 1.0, %v160_v25  ;;  %v1628_v22 = vpack.c.bf16 %v501_v21, %v500_v20  ;;  %v502_v25 = vld [vmem:[%s2126_s2 + $0xd0] sm:$0xff]  ;;  %v769_v20 = vld [vmem:[%s2126_s2 + $0x188] sm:$0xff] }
 0x17d   :  { %v167_v28 = vmul.f32 %v165_v24, %v163_v23  ;;  %v484_v23 = vld [vmem:[%s2126_s2 + $0x40] sm:$0xff]  ;;  %v485_v24 = vld [vmem:[%s2126_s2 + $0x48] sm:$0xff] }
 0x17e   :  { %v166_v29 = vmul.f32 %v164_v27, %v162_v26  ;;  %v503_v26 = vld [vmem:[%s2126_s2 + $0xd8] sm:$0xff]  ;;  %v1630_v27 = vpack.c.bf16 %v485_v24, %v484_v23  ;;  %v770_v23 = vld [vmem:[%s2126_s2 + $0x190] sm:$0xff] }
 0x17f   :  { %223 = vst.msk [vmem:[#allocation2 + $0x18] sm:$0xff] %vm34_vm0, %v167_v28  ;;  %254 = vst.msk [vmem:[#allocation2 + $0xe0] sm:$0xff] %vm34_vm0, %v167_v28  ;;  %228 = vrot.lane.b32.xlu1 %v167_v28, %s1745_s29  ;;  %v771_v24 = vld [vmem:[%s2126_s2 + $0x198] sm:$0xff] }
 0x180   :  { %262 = vst.msk [vmem:[#allocation2 + $0x1a8] sm:$0xff] %vm34_vm0, %v167_v28  ;;  %222 = vst.msk [vmem:[#allocation2] sm:$0xff] %vm34_vm0, %v166_v29  ;;  %235 = vrot.lane.b32.xlu0 %v166_v29, %s1746_s30 }
 0x181   :  { %253 = vst.msk [vmem:[#allocation2 + $0xc8] sm:$0xff] %vm34_vm0, %v166_v29  ;;  %261 = vst.msk [vmem:[#allocation2 + $0x190] sm:$0xff] %vm34_vm0, %v166_v29 }
 0x183   :  { %226 = vrot.lane.b32.xlu1 %v166_v29, %s1745_s29 }
 0x184   :  { %244 = vrot.lane.b32.xlu0 %v166_v29, %s1742_s19  ;;  %v486_v29 = vld [vmem:[%s2126_s2 + $0x50] sm:$0xff] }
 0x186   :  { %v270_v30 = vld [vmem:[#allocation2 + $0x18] sm:$0xff]  ;;  %v295_v56 = vld [vmem:[#allocation2 + $0xe0] sm:$0xff] }
 0x187   :  { %v320_v31 = vld [vmem:[#allocation2 + $0x1a8] sm:$0xff]  ;;  %237 = vrot.lane.b32.xlu1 %v167_v28, %s1746_s30  ;;  %v267_v32 = vld [vmem:[#allocation2] sm:$0xff] }
 0x188   :  { %v317_v33 = vld [vmem:[#allocation2 + $0x190] sm:$0xff]  ;;  %v1559_v34 = vpack.c.bf16 %v270_v30, %v267_v32  ;;  %v292_v55 = vld [vmem:[#allocation2 + $0xc8] sm:$0xff]  ;;  %v505_v32 = vld [vmem:[%s2126_s2 + $0xe8] sm:$0xff]  ;;  %677 = vrot.lane.b32.xlu0 %v1844_v36, %s1747_s0 }
 0x189   :  { %v1618_v35 = vpack.c.bf16 %v320_v31, %v317_v33  ;;  %v1573_v60 = vpack.c.bf16 %v295_v56, %v292_v55  ;;  %v487_v30 = vld [vmem:[%s2126_s2 + $0x58] sm:$0xff]  ;;  %v504_v31 = vld [vmem:[%s2126_s2 + $0xe0] sm:$0xff]  ;;  %v494_v55 = vld [vmem:[%s2126_s2 + $0x90] sm:$0xff] }
 0x18a   :  { %1560 = vmatpush1.bf16.msra.mxu1 %v1559_v34  ;;  %v1634_v33 = vpack.c.bf16 %v487_v30, %v486_v29  ;;  %v1636_v34 = vpack.c.bf16 %v505_v32, %v504_v31  ;;  %v495_v56 = vld [vmem:[%s2126_s2 + $0x98] sm:$0xff]  ;;  %v1322_v36 = vld [vmem:[%s2127_s3 + $0x1] ss:$0 sm:$0xff]  ;;  %v774_v30 = vld [vmem:[%s2126_s2 + $0x1b0] sm:$0xff] }
 0x18b   :  { %1619 = vmatpush1.bf16.msra.mxu0 %v1618_v35  ;;  %246 = vrot.lane.b32.xlu1 %v167_v28, %s1742_s19  ;;  %v1632_v28 = vpack.c.bf16 %v503_v26, %v502_v25  ;;  %v488_v35 = vld [vmem:[%s2126_s2 + $0x60] sm:$0xff]  ;;  %v1668_v26 = vpack.c.bf16 %v771_v24, %v770_v23  ;;  %v775_v31 = vld [vmem:[%s2126_s2 + $0x1b8] sm:$0xff] }
 0x18c   :  { %1562 = vmatprep.subr.bf16.mxu1 %v1744_v14  ;;  %1653 = vmatprep.subr.bf16.mxu0 %v1652_v42  ;;  %v1676_v32 = vpack.c.bf16 %v775_v31, %v774_v30  ;;  %v1340_v24 = vld [vmem:[%s2127_s3 + $0x5] ss:$0 sm:$0xff] }
 0x18e   :  { %470 = vmatmul.mubr.f32.vlgmr.msra.gmra.mrb[2].mxu0 %v1851_v37 }
 0x18f   :  { %1321 = vmatprep.mubr.msk.f32.mxu0 %vm321_vm3, %v1859_v38  ;;  %1655 = vmatpush3.bf16.msra.mxu0 %v1652_v42 }
 0x190   :  { %679 = vrot.lane.b32.xlu1 %v1859_v38, %s1747_s0 }
 0x192   :  { %475 = vmatmul.mubr.f32.gmra.mrb[4].mxu0 %v1866_v39 }
 0x1f1   :  { %v229_v43 = vpop.permute.xlu1 %228 }
 0x1f2   :  { %234 = vst.msk [vmem:[#allocation2 + $0x48] sm:$0xff] %vm232_vm4, %v229_v43  ;;  %256 = vst.msk [vmem:[#allocation2 + $0x110] sm:$0xff] %vm232_vm4, %v229_v43  ;;  %v236_v44 = vpop.permute.xlu0 %235  ;;  %v490_v43 = vld [vmem:[%s2126_s2 + $0x70] sm:$0xff] }
 0x1f3   :  { %242 = vst.msk [vmem:[#allocation2 + $0x60] sm:$0xff] %vm241_vm5, %v236_v44  ;;  %257 = vst.msk [vmem:[#allocation2 + $0x128] sm:$0xff] %vm241_vm5, %v236_v44  ;;  %v491_v44 = vld [vmem:[%s2126_s2 + $0x78] sm:$0xff] }
 0x1f5   :  { %v227_v45 = vpop.permute.xlu1 %226 }
 0x1f6   :  { %233 = vst.msk [vmem:[#allocation2 + $0x30] sm:$0xff] %vm232_vm4, %v227_v45  ;;  %255 = vst.msk [vmem:[#allocation2 + $0xf8] sm:$0xff] %vm232_vm4, %v227_v45  ;;  %v245_v46 = vpop.permute.xlu0 %244  ;;  %v508_v45 = vld [vmem:[%s2126_s2 + $0x100] sm:$0xff] }
 0x1f7   :  { %251 = vst.msk [vmem:[#allocation2 + $0x90] sm:$0xff] %vm250_vm6, %v245_v46  ;;  %259 = vst.msk [vmem:[#allocation2 + $0x158] sm:$0xff] %vm250_vm6, %v245_v46  ;;  %v509_v46 = vld [vmem:[%s2126_s2 + $0x108] sm:$0xff] }
 0x1f9   :  { %v238_v47 = vpop.permute.xlu1 %237  ;;  %v276_v50 = vld [vmem:[#allocation2 + $0x48] sm:$0xff]  ;;  %v301_v62 = vld [vmem:[#allocation2 + $0x110] sm:$0xff] }
 0x1fa   :  { %243 = vst.msk [vmem:[#allocation2 + $0x78] sm:$0xff] %vm241_vm5, %v238_v47  ;;  %258 = vst.msk [vmem:[#allocation2 + $0x140] sm:$0xff] %vm241_vm5, %v238_v47  ;;  %v279_v52 = vld [vmem:[#allocation2 + $0x60] sm:$0xff]  ;;  %v304_v2 = vld [vmem:[#allocation2 + $0x128] sm:$0xff]  ;;  %v1642_v47 = vpack.c.bf16 %v491_v44, %v490_v43  ;;  %v678_v9 = vpop.permute.xlu0 %677 }
 0x1fb   :  { %v766_v44 = vld [vmem:[%s2126_s2 + $0x170] sm:$0xff] }
 0x1fd   :  { %v247_v48 = vpop.permute.xlu1 %246  ;;  %v273_v49 = vld [vmem:[#allocation2 + $0x30] sm:$0xff]  ;;  %v298_v61 = vld [vmem:[#allocation2 + $0xf8] sm:$0xff] }
 0x1fe   :  { %252 = vst.msk [vmem:[#allocation2 + $0xa8] sm:$0xff] %vm250_vm6, %v247_v48  ;;  %260 = vst.msk [vmem:[#allocation2 + $0x170] sm:$0xff] %vm250_vm6, %v247_v48  ;;  %v1563_v51 = vpack.c.bf16 %v276_v50, %v273_v49  ;;  %v285_v57 = vld [vmem:[#allocation2 + $0x90] sm:$0xff]  ;;  %v1577_v63 = vpack.c.bf16 %v301_v62, %v298_v61  ;;  %v310_v6 = vld [vmem:[#allocation2 + $0x158] sm:$0xff]  ;;  %v1644_v48 = vpack.c.bf16 %v509_v46, %v508_v45 }
 0x1ff   :  { %v492_v49 = vld [vmem:[%s2126_s2 + $0x80] sm:$0xff]  ;;  %v493_v50 = vld [vmem:[%s2126_s2 + $0x88] sm:$0xff]  ;;  %v767_v45 = vld [vmem:[%s2126_s2 + $0x178] sm:$0xff] }
 0x200   :  { %1564 = vmatpush1.bf16.msra.mxu1 %v1563_v51  ;;  %v510_v51 = vld [vmem:[%s2126_s2 + $0x110] sm:$0xff]  ;;  %v1692_v46 = vpack.c.bf16 %v767_v45, %v766_v44 }
 0x201   :  { %1566 = vmatprep.subr.bf16.mxu1 %v1744_v14  ;;  %v282_v53 = vld [vmem:[#allocation2 + $0x78] sm:$0xff]  ;;  %v307_v1 = vld [vmem:[#allocation2 + $0x140] sm:$0xff] }
 0x202   :  { %v1567_v54 = vpack.c.bf16 %v282_v53, %v279_v52  ;;  %v1581_v3 = vpack.c.bf16 %v307_v1, %v304_v2  ;;  %v511_v52 = vld [vmem:[%s2126_s2 + $0x118] sm:$0xff]  ;;  %v1646_v53 = vpack.c.bf16 %v493_v50, %v492_v49  ;;  %v680_v25 = vpop.permute.xlu1 %679  ;;  %v952_v49 = vld [vmem:[%s2126_s2 + $0x1f0] sm:$0xff] }
 0x204   :  { %1568 = vmatpush1.bf16.msra.mxu1 %v1567_v54  ;;  %v1648_v54 = vpack.c.bf16 %v511_v52, %v510_v51  ;;  %v953_v51 = vld [vmem:[%s2126_s2 + $0x1f8] sm:$0xff] }
 0x205   :  { %1570 = vmatprep.subr.bf16.mxu1 %v1744_v14  ;;  %v288_v58 = vld [vmem:[#allocation2 + $0xa8] sm:$0xff]  ;;  %v313_v4 = vld [vmem:[#allocation2 + $0x170] sm:$0xff]  ;;  %v1700_v52 = vpack.c.bf16 %v953_v51, %v952_v49 }
 0x206   :  { %v1571_v59 = vpack.c.bf16 %v288_v58, %v285_v57  ;;  %v1585_v7 = vpack.c.bf16 %v313_v4, %v310_v6  ;;  %v1650_v57 = vpack.c.bf16 %v495_v56, %v494_v55  ;;  %v514_v58 = vld [vmem:[%s2126_s2 + $0x130] sm:$0xff] }
 0x208   :  { %1572 = vmatpush1.bf16.msra.mxu1 %v1571_v59  ;;  %v515_v59 = vld [vmem:[%s2126_s2 + $0x138] sm:$0xff] }
 0x209   :  { %1574 = vmatprep.subr.bf16.mxu1 %v1573_v60  ;;  %v1656_v60 = vpack.c.bf16 %v515_v59, %v514_v58  ;;  %v956_v58 = vld [vmem:[%s2126_s2 + $0x210] sm:$0xff]  ;;  %v957_v59 = vld [vmem:[%s2126_s2 + $0x218] sm:$0xff] }
 0x20b   :  { %1657 = vmatprep.subr.bf16.mxu0 %v1656_v60 }
 0x20c   :  { %1576 = vmatpush1.bf16.msra.mxu1 %v1744_v14  ;;  %1659 = vmatpush3.bf16.msra.mxu0 %v1656_v60  ;;  %v1708_v60 = vpack.c.bf16 %v957_v59, %v956_v58 }
 0x20d   :  { %1578 = vmatprep.subr.bf16.mxu1 %v1577_v63 }
 0x210   :  { %1580 = vmatpush1.bf16.msra.mxu1 %v1744_v14 }
 0x211   :  { %1582 = vmatprep.subr.bf16.mxu1 %v1581_v3 }
 0x214   :  { %1584 = vmatpush1.bf16.msra.mxu1 %v1744_v14 }
 0x215   :  { %1586 = vmatprep.subr.bf16.mxu1 %v1585_v7 }
 0x218   :  { %1588 = vmatpush1.bf16.msra.mxu1 %v1744_v14 }
 0x219   :  { %1590 = vmatprep.subr.bf16.mxu1 %v1744_v14 }
 0x21c   :  { %1592 = vmatpush1.bf16.msra.mxu1 %v1744_v14  ;;  %v1626_v14 = vpack.c.bf16 %v483_v19, %v482_v18  ;;  %v768_v19 = vld [vmem:[%s2126_s2 + $0x180] sm:$0xff] }
 0x21d   :  { %1621 = vmatprep.subr.bf16.mxu1 %v1620_v10 }
 0x21f   :  { %393 = vmatmul.mubr.f32.vlgmr.msra.gmra.mrb[0].mxu1 %v1851_v37  ;;  %v489_v37 = vld [vmem:[%s2126_s2 + $0x68] sm:$0xff] }
 0x220   :  { %1319 = vmatprep.mubr.msk.f32.mxu1 %vm321_vm3, %v1859_v38  ;;  %1623 = vmatpush3.bf16.msra.mxu1 %v1622_v16  ;;  %v1638_v41 = vpack.c.bf16 %v489_v37, %v488_v35  ;;  %v762_v37 = vld [vmem:[%s2126_s2 + $0x150] sm:$0xff] }
 0x221   :  { %1625 = vmatprep.subr.bf16.mxu1 %v1624_v17 }
 0x223   :  { %399 = vmatmul.mubr.f32.gmra.mrb[2].mxu1 %v1866_v39  ;;  %v506_v39 = vld [vmem:[%s2126_s2 + $0xf0] sm:$0xff] }
 0x224   :  { %1627 = vmatpush3.bf16.msra.mxu1 %v1626_v14  ;;  %v1640_v42 = vpack.c.bf16 %v507_v40, %v506_v39  ;;  %v763_v39 = vld [vmem:[%s2126_s2 + $0x158] sm:$0xff] }
 0x225   :  { %1629 = vmatprep.subr.bf16.mxu1 %v1628_v22  ;;  %v1664_v22 = vpack.c.bf16 %v769_v20, %v768_v19  ;;  %v1684_v40 = vpack.c.bf16 %v763_v39, %v762_v37 }
 0x228   :  { %1631 = vmatpush3.bf16.msra.mxu1 %v1630_v27  ;;  %v772_v27 = vld [vmem:[%s2126_s2 + $0x1a0] sm:$0xff] }
 0x229   :  { %1633 = vmatprep.subr.bf16.mxu1 %v1632_v28  ;;  %v773_v28 = vld [vmem:[%s2126_s2 + $0x1a8] sm:$0xff] }
 0x22a   :  { %v1672_v29 = vpack.c.bf16 %v773_v28, %v772_v27 }
 0x22c   :  { %1635 = vmatpush3.bf16.msra.mxu1 %v1634_v33  ;;  %v760_v33 = vld [vmem:[%s2126_s2 + $0x140] sm:$0xff] }
 0x22d   :  { %1637 = vmatprep.subr.bf16.mxu1 %v1636_v34  ;;  %v761_v34 = vld [vmem:[%s2126_s2 + $0x148] sm:$0xff] }
 0x22e   :  { %v1680_v35 = vpack.c.bf16 %v761_v34, %v760_v33 }
 0x230   :  { %1639 = vmatpush3.bf16.msra.mxu1 %v1638_v41  ;;  %v764_v41 = vld [vmem:[%s2126_s2 + $0x160] sm:$0xff] }
 0x231   :  { %1641 = vmatprep.subr.bf16.mxu1 %v1640_v42  ;;  %v765_v42 = vld [vmem:[%s2126_s2 + $0x168] sm:$0xff] }
 0x232   :  { %v1688_v43 = vpack.c.bf16 %v765_v42, %v764_v41 }
 0x234   :  { %1643 = vmatpush3.bf16.msra.mxu1 %v1642_v47  ;;  %v950_v47 = vld [vmem:[%s2126_s2 + $0x1e0] sm:$0xff] }
 0x235   :  { %1645 = vmatprep.subr.bf16.mxu1 %v1644_v48  ;;  %v951_v48 = vld [vmem:[%s2126_s2 + $0x1e8] sm:$0xff] }
 0x236   :  { %v1696_v50 = vpack.c.bf16 %v951_v48, %v950_v47 }
 0x238   :  { %1647 = vmatpush3.bf16.msra.mxu1 %v1646_v53  ;;  %v954_v53 = vld [vmem:[%s2126_s2 + $0x200] sm:$0xff] }
 0x239   :  { %1649 = vmatprep.subr.bf16.mxu1 %v1648_v54  ;;  %v955_v54 = vld [vmem:[%s2126_s2 + $0x208] sm:$0xff] }
 0x23a   :  { %v1704_v55 = vpack.c.bf16 %v955_v54, %v954_v53 }
 0x23c   :  { %1651 = vmatpush3.bf16.msra.mxu1 %v1650_v57 }
 0x23d   :  { %1697 = vmatprep.subr.bf16.mxu1 %v1696_v50 }
 0x261   :  { %v471_v61 = vpop.f32.mrb[2].mxu0 }
 0x262   :  { %v473_v62 = vpop.f32.mrb[3].mxu0  ;;  %1459 = vmatprep.mubr.msk.f32.mxu0 %vm34_vm0, %v471_v61  ;;  %v946_v61 = vld [vmem:[%s2126_s2 + $0x1c0] sm:$0xff] }
 0x263   :  { %v947_v62 = vld [vmem:[%s2126_s2 + $0x1c8] sm:$0xff] }
 0x265   :  { %v476_v63 = vpop.f32.mrb[4].mxu0 }
 0x266   :  { %1460 = vmatmul.mubr.msk.f32.vlgmr.msra.gmra.mrb[6].mxu0 %vm34_vm0, %v476_v63  ;;  %v478_v1 = vpop.f32.mrb[5].mxu0  ;;  %v1712_v63 = vpack.c.bf16 %v947_v62, %v946_v61 }
 0x267   :  { %1466 = vmatprep.mubr.msk.f32.mxu0 %vm321_vm3, %v678_v9  ;;  %v1331_v1 = vld [vmem:[%s2127_s3 + $0x2] ss:$0 sm:$0xff] }
 0x2f2   :  { %v394_v2 = vpop.f32.mrb[0].mxu1 }
 0x2f3   :  { %v396_v3 = vpop.f32.mrb[1].mxu1 }
 0x2f4   :  { %591 = vmatprep.mubr.f32.mxu1 %v396_v3  ;;  %v948_v3 = vld [vmem:[%s2126_s2 + $0x1d0] sm:$0xff] }
 0x2f5   :  { %592 = vmatmul.mubr.f32.vlgmr.msra.gmra.mrb[4].mxu1 %v394_v2 }
 0x2f6   :  { %v400_v4 = vpop.f32.mrb[2].mxu1  ;;  %1699 = vmatpush3.bf16.msra.mxu1 %v1696_v50 }
 0x2f7   :  { %v402_v6 = vpop.f32.mrb[3].mxu1  ;;  %1701 = vmatprep.subr.bf16.mxu1 %v1700_v52 }
 0x2f8   :  { %596 = vmatprep.mubr.f32.mxu1 %v402_v6 }
 0x2f9   :  { %597 = vmatmul.mubr.f32.gmra.mrb[6].mxu1 %v400_v4  ;;  %v949_v4 = vld [vmem:[%s2126_s2 + $0x1d8] sm:$0xff] }
 0x2fa   :  { %1703 = vmatpush3.bf16.msra.mxu1 %v1700_v52  ;;  %v1716_v9 = vpack.c.bf16 %v949_v4, %v948_v3 }
 0x2fb   :  { %1705 = vmatprep.subr.bf16.mxu1 %v1704_v55 }
 0x2fe   :  { %1707 = vmatpush3.bf16.msra.mxu1 %v1704_v55 }
 0x2ff   :  { %1709 = vmatprep.subr.bf16.mxu1 %v1708_v60 }
 0x302   :  { %1711 = vmatpush3.bf16.msra.mxu1 %v1708_v60 }
 0x303   :  { %1713 = vmatprep.subr.bf16.mxu1 %v1712_v63 }
 0x339   :  { %v1461_v7 = vpop.f32.mrb[6].mxu0 }
 0x33a   :  { %v668_v8 = vpop.f32.mrb[7].mxu0 }
 0x3c8   :  { %v1381_v10 = vpop.f32.mrb[4].mxu1 }
 0x3c9   :  { %v1382_v11 = vpop.f32.mrb[5].mxu1 }
 0x3ca   :  { %v1383_v38 = vadd.f32 %v1382_v11, %v1381_v10  ;;  %v1127_v10 = vld [vmem:[%s2126_s2 + $0x220] sm:$0xff]  ;;  %v1128_v11 = vld [vmem:[%s2126_s2 + $0x228] sm:$0xff] }
 0x3cc   :  { %v1384_v12 = vpop.f32.mrb[6].mxu1  ;;  %v594_v13 = vadd.f32 %v1383_v38, %v1322_v36 }
 0x3cd   :  { %v1385_v15 = vpop.f32.mrb[7].mxu1 }
 0x3ce   :  { %v1386_v16 = vadd.f32 %v1385_v15, %v1384_v12  ;;  %v669_v17 = vadd.f32 %v668_v8, %v594_v13 }
 0x3d0   :  { %v599_v18 = vadd.f32 %v1386_v16, %v1322_v36  ;;  %v1720_v36 = vpack.c.bf16 %v1128_v11, %v1127_v10 }
 0x3d2   :  { %v674_v21 = vadd.f32 %v1461_v7, %v599_v18  ;;  %v1337_v18 = vld [vmem:[%s2127_s3 + $0x4] ss:$0 sm:$0xff] }
 0x3d4   :  { %v1660_v14 = vpack.c.bf16 %v674_v21, %v669_v17 }
 0x3d6   :  { %1661 = vmatprep.subr.bf16.mxu0 %v1660_v14 }
 0x3d7   :  { %1663 = vmatpush3.bf16.msra.mxu0 %v1660_v14 }
 0x3d8   :  { %1665 = vmatprep.subr.bf16.mxu0 %v1664_v22 }
 0x3da   :  { %1467 = vmatmul.mubr.msk.f32.vlgmr.msra.gmra.mrb[8].mxu0 %vm321_vm3, %v680_v25 }
 0x3db   :  { %1667 = vmatpush3.bf16.msra.mxu0 %v1664_v22  ;;  %1485 = vmatprep.mubr.msk.f32.mxu0 %vm776_vm7, %v669_v17  ;;  %v1217_v17 = vld [vmem:[%s2126_s2 + $0x230] sm:$0xff] }
 0x3dc   :  { %1669 = vmatprep.subr.bf16.mxu0 %v1668_v26 }
 0x3df   :  { %1671 = vmatpush3.bf16.msra.mxu0 %v1668_v26 }
 0x3e0   :  { %1673 = vmatprep.subr.bf16.mxu0 %v1672_v29 }
 0x3e3   :  { %1675 = vmatpush3.bf16.msra.mxu0 %v1672_v29 }
 0x3e4   :  { %1677 = vmatprep.subr.bf16.mxu0 %v1676_v32 }
 0x3e7   :  { %1679 = vmatpush3.bf16.msra.mxu0 %v1676_v32 }
 0x3e8   :  { %1681 = vmatprep.subr.bf16.mxu0 %v1680_v35 }
 0x3ea   :  { %1486 = vmatmul.mubr.msk.f32.vlgmr.msra.gmra.mrb[10].mxu0 %vm776_vm7, %v674_v21 }
 0x3eb   :  { %1683 = vmatpush3.bf16.msra.mxu0 %v1680_v35 }
 0x3ec   :  { %1685 = vmatprep.subr.bf16.mxu0 %v1684_v40 }
 0x3ef   :  { %1687 = vmatpush3.bf16.msra.mxu0 %v1684_v40 }
 0x3f0   :  { %1689 = vmatprep.subr.bf16.mxu0 %v1688_v43 }
 0x3f3   :  { %1691 = vmatpush3.bf16.msra.mxu0 %v1688_v43 }
 0x3f4   :  { %1693 = vmatprep.subr.bf16.mxu0 %v1692_v46 }
 0x3f7   :  { %1695 = vmatpush3.bf16.msra.mxu0 %v1692_v46 }
 0x3f8   :  { %1721 = vmatprep.subr.bf16.mxu0 %v1720_v36 }
 0x4ad   :  { %v1468_v56 = vpop.f32.mrb[8].mxu0 }
 0x4ae   :  { %v751_v57 = vpop.f32.mrb[9].mxu0 }
 0x4af   :  { %1504 = vmatprep.mubr.msk.f32.mxu0 %vm776_vm7, %v751_v57 }
 0x4b0   :  { %1505 = vmatmul.mubr.msk.f32.vlgmr.msra.gmra.mrb[10].mxu0 %vm776_vm7, %v1468_v56 }
 0x4b1   :  { %1723 = vmatpush3.bf16.msra.mxu0 %v1720_v36 }
 0x4b2   :  { %1544 = vmatprep.subr.mxu0 %v1217_v17 }
 0x583   :  { %v1506_v2 = vpop.f32.mrb[10].mxu0 }
 0x584   :  { %v930_v6 = vpop.f32.mrb[11].mxu0  ;;  %v945_v8 = vadd.f32 %v1506_v2, %v1331_v1 }
 0x585   :  { %v944_v7 = vadd.f32 %v1331_v1, %v930_v6 }
 0x587   :  { %1523 = vmatprep.mubr.msk.f32.mxu1 %vm776_vm7, %v944_v7 }
 0x588   :  { %1524 = vmatmul.mubr.msk.f32.vlgmr.msra.gmra.mrb[8].mxu1 %vm776_vm7, %v945_v8 }
 0x589   :  { %1715 = vmatpush3.bf16.msra.mxu1 %v1712_v63  ;;  %1534 = vmatprep.mubr.msk.f32.mxu1 %vm34_vm0, %v1776_v0  ;;  %v1336_v0 = vld [vmem:[%s2127_s3 + $0x3] ss:$0 sm:$0xff] }
 0x58a   :  { %1717 = vmatprep.subr.bf16.mxu1 %v1716_v9 }
 0x58d   :  { %1719 = vmatpush3.bf16.msra.mxu1 %v1716_v9 }
 0x590   :  { %1535 = vmatmul.mubr.msk.f32.vlgmr.msra.gmra.mrb[8].mxu1 %vm34_vm0, %v1795_v5 }
 0x663   :  { %v1536_v38 = vpop.f32.mrb[8].mxu1 }
 0x664   :  { %v1124_v12 = vadd.f32 %v1536_v38, %v1336_v0  ;;  %v1109_v13 = vpop.f32.mrb[9].mxu1 }
 0x665   :  { %v1123_v15 = vadd.f32 %v1336_v0, %v1109_v13 }
 0x666   :  { %v1126_v16 = vmax.f32 %v1124_v12, 0.0 }
 0x667   :  { %v1125_v5 = vmax.f32 %v1123_v15, 0.0 }
 0x669   :  { %1541 = vmatprep.mubr.msk.f32.mxu0 %vm321_vm3, %v1125_v5 }
 0x66a   :  { %1542 = vmatmul.mubr.msk.f32.vlgmr.msra.gmra.mrb[12].mxu0 %vm321_vm3, %v1126_v16 }
 0x66b   :  { %1545 = vmatpush3.msra.mxu0 %v1217_v17 }
 0x73d   :  { %v1543_v19 = vpop.f32.mrb[12].mxu0 }
 0x73e   :  { %v1212_v20 = vadd.f32 %v1543_v19, %v1337_v18  ;;  %v1206_v21 = vpop.f32.mrb[13].mxu0 }
 0x73f   :  { %v1207_v14 = vadd.f32 %v1337_v18, %v1206_v21 }
 0x740   :  { %v1216_v23 = vmax.f32 %v1212_v20, 0.0 }
 0x741   :  { %v1215_v22 = vmax.f32 %v1207_v14, 0.0 }
 0x743   :  { %1546 = vmatprep.mubr.msk.f32.mxu0 %vm1223_vm8, %v1215_v22 }
 0x744   :  { %1547 = vmatmul.mubr.msk.f32.vlgmr.msra.gmra.mrb[14].mxu0 %vm1223_vm8, %v1216_v23 }
 0x817   :  { %v1548_v25 = vpop.f32.mrb[14].mxu0 }
 0x818   :  { %v1302_v26 = vadd.f32 %v1548_v25, %v1340_v24  ;;  %v1296_v27 = vpop.f32.mrb[15].mxu0 }
 0x819   :  { %v1297_v28 = vadd.f32 %v1340_v24, %v1296_v27 }
 0x81a   :  { %1306 = vst.msk [vmem:[%s2129_s4 + $0x8] sm:$0xff] %vm1223_vm8, %v1302_v26 }
 0x81b   :  { %1305 = vst.msk [vmem:[%s2129_s4] sm:$0xff] %vm1223_vm8, %v1297_v28 }

</bundles_post_ra>
